<compile_context>
chip_gen: v7x
topology: tpu7x:2x2x1
jax: 0.10.0
libtpu: 0.0.40
codegen_flags: <defaults>
</compile_context>

<pallas_src>
import numpy as np
import jax
import jax.numpy as jnp
from jax.experimental import pallas as pl
from jax.experimental.pallas import tpu as pltpu


# ----------------------------- Pallas kernel --------------------------------

def _cnn_kernel(x_ref, w1_ref, w2_ref, vec_ref, se1_ref, se2_ref,
                fc1_ref, fc2_ref, out_ref):
    f32, bf16 = jnp.float32, jnp.bfloat16

    v = vec_ref[...]                                   # (8, 128) packed per-channel vectors
    c2 = w1_ref.shape[1]                               # 2*out_channels   (128)
    c42 = w2_ref.shape[1]                              # out_channels//2  (32)
    nh = fc1_ref.shape[1]                              # out_channels//8  (8)
    no = out_ref.shape[1]                              # output_size      (2)
    b1, s1, t1 = v[0:1, :c2], v[1:2, :c2], v[2:3, :c2]
    b2, s2, t2 = v[3:4, :c42], v[4:5, :c42], v[5:6, :c42]
    fb1, fb2 = v[6:7, :nh], v[7:8, :no]

    def conv_relu_bn_pool(h_bf16, w_ref, b, s, t):
        # Fused dual-branch Conv1d (L=1 -> center tap) as one block-diagonal matmul,
        # + bias, ReLU, BatchNorm1d(eval) as per-channel scale/shift, then
        # MaxPool1d(2): output channels were pre-permuted so the pool is an
        # elementwise max of the two contiguous lane halves.
        z = jnp.dot(h_bf16, w_ref[...], preferred_element_type=f32)
        z = jnp.maximum(z + b, 0.0) * s + t
        n = z.shape[1]
        return jnp.maximum(z[:, : n // 2], z[:, n // 2:])

    # In-kernel f32->bf16 cast of the streaming activations (VPU work, hidden
    # under the HBM DMA).  No-op if the caller already supplies bf16.
    h = conv_relu_bn_pool(x_ref[...].astype(bf16), w1_ref, b1, s1, t1)   # (tb, 64)
    h = conv_relu_bn_pool(h.astype(bf16), w2_ref, b2, s2, t2)            # (tb, 16) = cat(ESM, ProtT5)

    # Dropout: identity in eval mode.
    # SE block (mean over the length-1 spatial dim is the identity).  Tiny
    # matmuls with bf16 operands / f32 accumulation.
    y = jnp.maximum(jnp.dot(h.astype(bf16), se1_ref[...], preferred_element_type=f32), 0.0)
    y = jnp.dot(y.astype(bf16), se2_ref[...], preferred_element_type=f32)
    y = 1.0 / (1.0 + jnp.exp(-y))                      # exact sigmoid (tiny; cost hidden)
    h = h * y

    # MLP head.
    z = jnp.maximum(jnp.dot(h.astype(bf16), fc1_ref[...], preferred_element_type=f32) + fb1, 0.0)
    out_ref[...] = jnp.dot(z.astype(bf16), fc2_ref[...], preferred_element_type=f32) + fb2


# ----------------------- one-time parameter folding --------------------------

def prepare_fused_params(p, in1, in2, eps=1e-5):
    """Fold PyTorch-layout parameters into kernel-ready fused tensors.

    Run ONCE, eagerly (outside jit): it moves tiny tensors host-side to build the
    packed vector tile.
    """
    pad = p["pad"]
    f32, bf16 = jnp.float32, jnp.bfloat16

    def bn(name):   # eval-mode BatchNorm1d as per-channel scale/shift
        s = p[name + "_gamma"] / jnp.sqrt(p[name + "_var"] + eps)
        t = p[name + "_beta"] - p[name + "_mean"] * s
        return s, t

    s1e, t1e = bn("bn1e"); s1p, t1p = bn("bn1p")
    s2e, t2e = bn("bn2e"); s2p, t2p = bn("bn2p")

    def pool_perm(n_cols):
        # Column permutation so MaxPool1d(2) == max of the two contiguous halves,
        # with the two branches laid out back-to-back after pooling.
        half = n_cols // 2
        even = np.arange(0, half, 2)
        odd = np.arange(1, half, 2)
        return np.concatenate([even, half + even, odd, half + odd])

    c = p["conv1e_w"].shape[0]          # out_channels per branch (layer 1)
    c4 = c // 4                         # out channels per branch (layer 2)
    out_size = p["fc2_b"].shape[0]
    assert 2 * c <= 128 and 2 * c4 <= 128 and p["fc1_b"].shape[0] <= 128 \
        and out_size <= 128, "packed per-channel vector tile assumes widths <= 128"

    # ---- layer 1: block-diagonal fused conv (center tap only), pool-permuted.
    w1 = jnp.zeros((in1 + in2, 2 * c), f32)
    w1 = w1.at[:in1, :c].set(p["conv1e_w"][:, :, pad].T)
    w1 = w1.at[in1:, c:].set(p["conv1p_w"][:, :, pad].T)
    b1 = jnp.concatenate([p["conv1e_b"], p["conv1p_b"]])
    s1 = jnp.concatenate([s1e, s1p]); t1 = jnp.concatenate([t1e, t1p])
    perm1 = pool_perm(2 * c)
    w1, b1, s1, t1 = w1[:, perm1], b1[perm1], s1[perm1], t1[perm1]

    # ---- layer 2: same treatment.
    w2 = jnp.zeros((c, 2 * c4), f32)
    w2 = w2.at[:c // 2, :c4].set(p["conv2e_w"][:, :, pad].T)
    w2 = w2.at[c // 2:, c4:].set(p["conv2p_w"][:, :, pad].T)
    b2 = jnp.concatenate([p["conv2e_b"], p["conv2p_b"]])
    s2 = jnp.concatenate([s2e, s2p]); t2 = jnp.concatenate([t2e, t2p])
    perm2 = pool_perm(2 * c4)
    w2, b2, s2, t2 = w2[:, perm2], b2[perm2], s2[perm2], t2[perm2]

    # ---- pack all per-channel vectors + fc biases into ONE (8,128) f32 tile.
    vec = np.zeros((8, 128), np.float32)
    for row, val in enumerate((b1, s1, t1, b2, s2, t2, p["fc1_b"], p["fc2_b"])):
        val = np.asarray(val, np.float32)
        vec[row, : val.shape[0]] = val

    return {
        "w1": w1.astype(bf16), "w2": w2.astype(bf16),
        "vec": jnp.asarray(vec),
        "se_w1": p["se_w1"].T.astype(bf16), "se_w2": p["se_w2"].T.astype(bf16),
        "fc1_w": p["fc1_w"].T.astype(bf16), "fc2_w": p["fc2_w"].T.astype(bf16),
    }


# --------------------------- tiling / VMEM budget -----------------------------

_MIN_TILE_ROWS = 512   # below this the ~0.35us per-grid-step overhead starts to bite


def _round_up(n, m):
    return ((n + m - 1) // m) * m


def _device_budget():
    """Per-generation (row-tile cap, scoped-VMEM limit).

      v6e : 128 MiB VMEM, 1.4 TB/s HBM -> tb<=2048 (24 MiB double-buffered f32 x)
            with a 64 MiB scope.
      v5e : 16 MiB default scope, ~0.8 TB/s HBM -> tb<=1024, scope raised to 32 MiB.
      v7x : only 64 MiB VMEM per TensorCore -> stay at tb<=1024 / 32 MiB scope.
    Unknown device kinds use the conservative (v7x-safe) setting.
    """
    try:
        kind = jax.devices()[0].device_kind.lower()
    except Exception:
        kind = ""
    if "v6" in kind:
        return 2048, 64 << 20
    return 1024, 32 << 20


def _pick_tile(b, tb_max):
    # Aim for >=4 grid steps on large batches (so v7x's two TensorCores each get
    # >=2 steps and prefetch/writeback overlap exists) while keeping tiles
    # >= _MIN_TILE_ROWS.  Small batches use a single block whose row extent
    # equals the batch (allowed: block dim == full array dim).
    tb = max(_MIN_TILE_ROWS, _round_up(pl.cdiv(b, 4), 8))
    return min(tb, tb_max, b)


# ------------------------------ JAX wrapper ----------------------------------

def cnn_forward(x, fp):
    """Fused CNNModel forward.

    x : (batch, in1+in2) activations, f32 or bf16 (bf16 halves the dominant HBM
        stream; the kernel casts to bf16 internally either way).  The wrapper
        performs NO pad / cast / copy of x: partial trailing batch blocks use
        Pallas's masked loads/stores, which is safe because every row is
        computed independently and out-of-range output rows are write-masked.
    fp: dict produced by prepare_fused_params().
    """
    b, d_in = x.shape
    out_size = fp["fc2_w"].shape[1]
    tb_max, vmem_bytes = _device_budget()
    tb = _pick_tile(b, tb_max)

    weights = (fp["w1"], fp["w2"], fp["vec"], fp["se_w1"], fp["se_w2"],
               fp["fc1_w"], fp["fc2_w"])

    in_specs = [pl.BlockSpec((tb, d_in), lambda i: (i, 0))]
    # Weights: full-shape blocks with a constant block index -> DMA'd once and
    # VMEM-resident while the batch axis streams.
    in_specs += [pl.BlockSpec(w.shape, lambda i: (0, 0)) for w in weights]

    return pl.pallas_call(
        _cnn_kernel,
        out_shape=jax.ShapeDtypeStruct((b, out_size), jnp.float32),
        grid=(pl.cdiv(b, tb),),
        in_specs=in_specs,
        out_specs=pl.BlockSpec((tb, out_size), lambda i: (i, 0)),
        compiler_params=pltpu.CompilerParams(
            dimension_semantics=("parallel",),        # v7x: shard batch over both TCs
            vmem_limit_bytes=vmem_bytes),
    )(x, *weights)


# ------------------------- parameter construction ----------------------------

def make_params(key, in1, in2, out_channels, kernel_size, output_size, reduction):
    ks = jax.random.split(key, 12)
    c = out_channels
    pad = (kernel_size - 1) // 2

    def n(k, shape, scale=0.1):
        return scale * jax.random.normal(k, shape, dtype=jnp.float32)

    p = {}
    # Full Conv1d weights (out, in, k); only the center tap matters for L=1 input.
    p["conv1e_w"] = n(ks[0], (c, in1, kernel_size))
    p["conv1e_b"] = n(ks[1], (c,))
    p["conv1p_w"] = n(ks[2], (c, in2, kernel_size))
    p["conv1p_b"] = n(ks[3], (c,))
    p["conv2e_w"] = n(ks[4], (c // 4, c // 2, kernel_size))
    p["conv2e_b"] = n(ks[5], (c // 4,))
    p["conv2p_w"] = n(ks[6], (c // 4, c // 2, kernel_size))
    p["conv2p_b"] = n(ks[7], (c // 4,))
    # SE block (Linear, no bias): PyTorch weight is (out, in).
    p["se_w1"] = n(ks[8], (c // (4 * reduction), c // 4))
    p["se_w2"] = n(ks[9], (c // 4, c // (4 * reduction)))
    # MLP head.
    p["fc1_w"] = n(ks[10], (c // 8, c // 4))
    p["fc1_b"] = jnp.zeros((c // 8,), jnp.float32)
    p["fc2_w"] = n(ks[11], (output_size, c // 8))
    p["fc2_b"] = jnp.zeros((output_size,), jnp.float32)
    # BatchNorm1d buffers (eval mode defaults).
    for name, ch in (("bn1e", c), ("bn1p", c), ("bn2e", c // 4), ("bn2p", c // 4)):
        p[name + "_gamma"] = jnp.ones((ch,), jnp.float32)
        p[name + "_beta"] = jnp.zeros((ch,), jnp.float32)
        p[name + "_mean"] = jnp.zeros((ch,), jnp.float32)
        p[name + "_var"] = jnp.ones((ch,), jnp.float32)
    p["pad"] = pad
    return p


# ---------------------- pure-JAX (f32, PyTorch-faithful) reference -----------

def _ref_forward(x, p, in1, eps=1e-5):
    pad = p["pad"]

    def bn(z, name):
        s = p[name + "_gamma"] / jnp.sqrt(p[name + "_var"] + eps)
        t = p[name + "_beta"] - p[name + "_mean"] * s
        return z * s[None, :] + t[None, :]

    def conv_block(v, wname, bname, bnname):
        # Conv1d on a length-1, zero-padded sequence == matmul with the center tap.
        w = p[wname][:, :, pad].T
        z = v @ w + p[bname][None, :]
        return bn(jnp.maximum(z, 0.0), bnname)

    def pool(v):
        return v.reshape(v.shape[0], -1, 2).max(axis=-1)

    xe, xp = x[:, :in1], x[:, in1:]
    he = pool(conv_block(xe, "conv1e_w", "conv1e_b", "bn1e"))
    hp = pool(conv_block(xp, "conv1p_w", "conv1p_b", "bn1p"))
    he = pool(conv_block(he, "conv2e_w", "conv2e_b", "bn2e"))
    hp = pool(conv_block(hp, "conv2p_w", "conv2p_b", "bn2p"))
    h = jnp.concatenate([he, hp], axis=1)
    y = jnp.maximum(h @ p["se_w1"].T, 0.0) @ p["se_w2"].T
    h = h * jax.nn.sigmoid(y)
    z = jnp.maximum(h @ p["fc1_w"].T + p["fc1_b"], 0.0)
    return z @ p["fc2_w"].T + p["fc2_b"]


# ---------------------------------- main -------------------------------------

if __name__ == "__main__":
    # in_channels1=1280 is forced by the hard-coded split x[:, :1280] in the model.
    IN1, IN2 = 1280, 256
    OUT_CH = 64
    KSIZE = 3
    OUT_SIZE = 2
    REDUCTION = 4
    BATCH = 2

    key = jax.random.PRNGKey(0)
    k_x, k_p = jax.random.split(key)
    x = jax.random.normal(k_x, (BATCH, IN1 + IN2), dtype=jnp.float32)
    params = make_params(k_p, IN1, IN2, OUT_CH, KSIZE, OUT_SIZE, REDUCTION)

    fused = prepare_fused_params(params, IN1, IN2)   # one-time, eager weight folding
    fwd = jax.jit(cnn_forward)

    out = jax.block_until_ready(fwd(x, fused))

    ref = _ref_forward(x, params, IN1)
    assert out.shape == (BATCH, OUT_SIZE), out.shape
    # Kernel uses bf16 matmul operands (f32 accumulation) vs. the exact-f32 reference.
    assert jnp.allclose(out, ref, atol=2e-2, rtol=2e-2), (out, ref)

    print("KERNEL_OK")
</pallas_src>

<mosaic_0001>
module attributes {stable_mosaic.version = 11 : i64} {
  func.func @_cnn_kernel(%arg0: i32, %arg1: memref<2x1536xf32, #tpu.memory_space<vmem>>, %arg2: memref<1536x128xbf16, #tpu.memory_space<vmem>>, %arg3: memref<64x32xbf16, #tpu.memory_space<vmem>>, %arg4: memref<8x128xf32, #tpu.memory_space<vmem>>, %arg5: memref<16x4xbf16, #tpu.memory_space<vmem>>, %arg6: memref<4x16xbf16, #tpu.memory_space<vmem>>, %arg7: memref<16x8xbf16, #tpu.memory_space<vmem>>, %arg8: memref<8x2xbf16, #tpu.memory_space<vmem>>, %arg9: memref<2x2xf32, #tpu.memory_space<vmem>>) attributes {dimension_semantics = [#tpu.dimension_semantics<parallel>], iteration_bounds = array<i64: 1>, scalar_prefetch = 0 : i64, scratch_operands = 0 : i64, tpu.core_type = #tpu.core_type<tc>, window_params = [{transform_indices = @transform_0, window_bounds = array<i64: 2, 1536>}, {pipeline_mode = #tpu.pipeline_mode<synchronous>, transform_indices = @transform_1, window_bounds = array<i64: 1536, 128>}, {pipeline_mode = #tpu.pipeline_mode<synchronous>, transform_indices = @transform_2, window_bounds = array<i64: 64, 32>}, {pipeline_mode = #tpu.pipeline_mode<synchronous>, transform_indices = @transform_3, window_bounds = array<i64: 8, 128>}, {pipeline_mode = #tpu.pipeline_mode<synchronous>, transform_indices = @transform_4, window_bounds = array<i64: 16, 4>}, {pipeline_mode = #tpu.pipeline_mode<synchronous>, transform_indices = @transform_5, window_bounds = array<i64: 4, 16>}, {pipeline_mode = #tpu.pipeline_mode<synchronous>, transform_indices = @transform_6, window_bounds = array<i64: 16, 8>}, {pipeline_mode = #tpu.pipeline_mode<synchronous>, transform_indices = @transform_7, window_bounds = array<i64: 8, 2>}, {transform_indices = @transform_8, window_bounds = array<i64: 2, 2>}]} {
    %c0 = arith.constant 0 : index
    %c0_0 = arith.constant 0 : index
    %0 = vector.load %arg4[%c0, %c0_0] : memref<8x128xf32, #tpu.memory_space<vmem>>, vector<8x128xf32>
    %1 = vector.extract_strided_slice %0 {offsets = [0, 0], sizes = [1, 128], strides = [1, 1]} : vector<8x128xf32> to vector<1x128xf32>
    %2 = vector.extract_strided_slice %0 {offsets = [1, 0], sizes = [1, 128], strides = [1, 1]} : vector<8x128xf32> to vector<1x128xf32>
    %3 = vector.extract_strided_slice %0 {offsets = [2, 0], sizes = [1, 128], strides = [1, 1]} : vector<8x128xf32> to vector<1x128xf32>
    %4 = vector.extract_strided_slice %0 {offsets = [3, 0], sizes = [1, 32], strides = [1, 1]} : vector<8x128xf32> to vector<1x32xf32>
    %5 = vector.extract_strided_slice %0 {offsets = [4, 0], sizes = [1, 32], strides = [1, 1]} : vector<8x128xf32> to vector<1x32xf32>
    %6 = vector.extract_strided_slice %0 {offsets = [5, 0], sizes = [1, 32], strides = [1, 1]} : vector<8x128xf32> to vector<1x32xf32>
    %7 = vector.extract_strided_slice %0 {offsets = [6, 0], sizes = [1, 8], strides = [1, 1]} : vector<8x128xf32> to vector<1x8xf32>
    %8 = vector.extract_strided_slice %0 {offsets = [7, 0], sizes = [1, 2], strides = [1, 1]} : vector<8x128xf32> to vector<1x2xf32>
    %c0_1 = arith.constant 0 : index
    %c0_2 = arith.constant 0 : index
    %9 = vector.load %arg1[%c0_1, %c0_2] : memref<2x1536xf32, #tpu.memory_space<vmem>>, vector<2x1536xf32>
    %10 = arith.truncf %9 : vector<2x1536xf32> to vector<2x1536xbf16>
    %c0_3 = arith.constant 0 : index
    %c0_4 = arith.constant 0 : index
    %11 = vector.load %arg2[%c0_3, %c0_4] : memref<1536x128xbf16, #tpu.memory_space<vmem>>, vector<1536x128xbf16>
    %cst = arith.constant dense<0.000000e+00> : vector<2x128xf32>
    %12 = tpu.matmul %10, %11, %cst {dimension_numbers = #tpu.dot_dimension_numbers<[1], [0], [0], [1], [0, 0, 1, 1], [], []>} : vector<2x1536xbf16>, vector<1536x128xbf16>, vector<2x128xf32> -> vector<2x128xf32>
    %13 = vector.broadcast %1 : vector<1x128xf32> to vector<2x128xf32>
    %14 = arith.addf %12, %13 : vector<2x128xf32>
    %cst_5 = arith.constant 0.000000e+00 : f32
    %15 = vector.broadcast %cst_5 : f32 to vector<2x128xf32>
    %16 = arith.maximumf %14, %15 : vector<2x128xf32>
    %17 = vector.broadcast %2 : vector<1x128xf32> to vector<2x128xf32>
    %18 = arith.mulf %16, %17 : vector<2x128xf32>
    %19 = vector.broadcast %3 : vector<1x128xf32> to vector<2x128xf32>
    %20 = arith.addf %18, %19 : vector<2x128xf32>
    %21 = vector.extract_strided_slice %20 {offsets = [0, 0], sizes = [2, 64], strides = [1, 1]} : vector<2x128xf32> to vector<2x64xf32>
    %22 = vector.extract_strided_slice %20 {offsets = [0, 64], sizes = [2, 64], strides = [1, 1]} : vector<2x128xf32> to vector<2x64xf32>
    %23 = arith.maximumf %21, %22 : vector<2x64xf32>
    %24 = arith.truncf %23 : vector<2x64xf32> to vector<2x64xbf16>
    %c0_6 = arith.constant 0 : index
    %c0_7 = arith.constant 0 : index
    %25 = vector.load %arg3[%c0_6, %c0_7] : memref<64x32xbf16, #tpu.memory_space<vmem>>, vector<64x32xbf16>
    %cst_8 = arith.constant dense<0.000000e+00> : vector<2x32xf32>
    %26 = tpu.matmul %24, %25, %cst_8 {dimension_numbers = #tpu.dot_dimension_numbers<[1], [0], [0], [1], [0, 0, 1, 1], [], []>} : vector<2x64xbf16>, vector<64x32xbf16>, vector<2x32xf32> -> vector<2x32xf32>
    %27 = vector.broadcast %4 : vector<1x32xf32> to vector<2x32xf32>
    %28 = arith.addf %26, %27 : vector<2x32xf32>
    %cst_9 = arith.constant 0.000000e+00 : f32
    %29 = vector.broadcast %cst_9 : f32 to vector<2x32xf32>
    %30 = arith.maximumf %28, %29 : vector<2x32xf32>
    %31 = vector.broadcast %5 : vector<1x32xf32> to vector<2x32xf32>
    %32 = arith.mulf %30, %31 : vector<2x32xf32>
    %33 = vector.broadcast %6 : vector<1x32xf32> to vector<2x32xf32>
    %34 = arith.addf %32, %33 : vector<2x32xf32>
    %35 = vector.extract_strided_slice %34 {offsets = [0, 0], sizes = [2, 16], strides = [1, 1]} : vector<2x32xf32> to vector<2x16xf32>
    %36 = vector.extract_strided_slice %34 {offsets = [0, 16], sizes = [2, 16], strides = [1, 1]} : vector<2x32xf32> to vector<2x16xf32>
    %37 = arith.maximumf %35, %36 : vector<2x16xf32>
    %38 = arith.truncf %37 : vector<2x16xf32> to vector<2x16xbf16>
    %c0_10 = arith.constant 0 : index
    %c0_11 = arith.constant 0 : index
    %39 = vector.load %arg5[%c0_10, %c0_11] : memref<16x4xbf16, #tpu.memory_space<vmem>>, vector<16x4xbf16>
    %cst_12 = arith.constant dense<0.000000e+00> : vector<2x4xf32>
    %40 = tpu.matmul %38, %39, %cst_12 {dimension_numbers = #tpu.dot_dimension_numbers<[1], [0], [0], [1], [0, 0, 1, 1], [], []>} : vector<2x16xbf16>, vector<16x4xbf16>, vector<2x4xf32> -> vector<2x4xf32>
    %cst_13 = arith.constant 0.000000e+00 : f32
    %41 = vector.broadcast %cst_13 : f32 to vector<2x4xf32>
    %42 = arith.maximumf %40, %41 : vector<2x4xf32>
    %43 = arith.truncf %42 : vector<2x4xf32> to vector<2x4xbf16>
    %c0_14 = arith.constant 0 : index
    %c0_15 = arith.constant 0 : index
    %44 = vector.load %arg6[%c0_14, %c0_15] : memref<4x16xbf16, #tpu.memory_space<vmem>>, vector<4x16xbf16>
    %cst_16 = arith.constant dense<0.000000e+00> : vector<2x16xf32>
    %45 = tpu.matmul %43, %44, %cst_16 {dimension_numbers = #tpu.dot_dimension_numbers<[1], [0], [0], [1], [0, 0, 1, 1], [], []>} : vector<2x4xbf16>, vector<4x16xbf16>, vector<2x16xf32> -> vector<2x16xf32>
    %cst_17 = arith.constant 0.000000e+00 : f32
    %46 = vector.broadcast %cst_17 : f32 to vector<2x16xf32>
    %47 = arith.subf %46, %45 : vector<2x16xf32>
    %48 = math.exp %47 : vector<2x16xf32>
    %cst_18 = arith.constant 1.000000e+00 : f32
    %49 = vector.broadcast %cst_18 : f32 to vector<2x16xf32>
    %50 = arith.addf %49, %48 : vector<2x16xf32>
    %cst_19 = arith.constant 1.000000e+00 : f32
    %51 = vector.broadcast %cst_19 : f32 to vector<2x16xf32>
    %52 = arith.divf %51, %50 : vector<2x16xf32>
    %53 = arith.mulf %37, %52 : vector<2x16xf32>
    %54 = arith.truncf %53 : vector<2x16xf32> to vector<2x16xbf16>
    %c0_20 = arith.constant 0 : index
    %c0_21 = arith.constant 0 : index
    %55 = vector.load %arg7[%c0_20, %c0_21] : memref<16x8xbf16, #tpu.memory_space<vmem>>, vector<16x8xbf16>
    %cst_22 = arith.constant dense<0.000000e+00> : vector<2x8xf32>
    %56 = tpu.matmul %54, %55, %cst_22 {dimension_numbers = #tpu.dot_dimension_numbers<[1], [0], [0], [1], [0, 0, 1, 1], [], []>} : vector<2x16xbf16>, vector<16x8xbf16>, vector<2x8xf32> -> vector<2x8xf32>
    %57 = vector.broadcast %7 : vector<1x8xf32> to vector<2x8xf32>
    %58 = arith.addf %56, %57 : vector<2x8xf32>
    %cst_23 = arith.constant 0.000000e+00 : f32
    %59 = vector.broadcast %cst_23 : f32 to vector<2x8xf32>
    %60 = arith.maximumf %58, %59 : vector<2x8xf32>
    %61 = arith.truncf %60 : vector<2x8xf32> to vector<2x8xbf16>
    %c0_24 = arith.constant 0 : index
    %c0_25 = arith.constant 0 : index
    %62 = vector.load %arg8[%c0_24, %c0_25] : memref<8x2xbf16, #tpu.memory_space<vmem>>, vector<8x2xbf16>
    %cst_26 = arith.constant dense<0.000000e+00> : vector<2x2xf32>
    %63 = tpu.matmul %61, %62, %cst_26 {dimension_numbers = #tpu.dot_dimension_numbers<[1], [0], [0], [1], [0, 0, 1, 1], [], []>} : vector<2x8xbf16>, vector<8x2xbf16>, vector<2x2xf32> -> vector<2x2xf32>
    %64 = vector.broadcast %8 : vector<1x2xf32> to vector<2x2xf32>
    %65 = arith.addf %63, %64 : vector<2x2xf32>
    %c0_27 = arith.constant 0 : index
    %c0_28 = arith.constant 0 : index
    %66 = vector.load %arg9[%c0_27, %c0_28] : memref<2x2xf32, #tpu.memory_space<vmem>>, vector<2x2xf32>
    tpu.vector_store %arg9[%c0_27, %c0_28], %65 {strides = array<i32>} : memref<2x2xf32, #tpu.memory_space<vmem>>, vector<2x2xf32>,
    return
  }
  func.func @transform_0(%arg0: i32) -> (i32, i32) {
    %c0_i32 = arith.constant 0 : i32
    %c0_i32_0 = arith.constant 0 : i32
    return %arg0, %c0_i32 : i32, i32
  }
  func.func @transform_1(%arg0: i32) -> (i32, i32) {
    %c0_i32 = arith.constant 0 : i32
    %c0_i32_0 = arith.constant 0 : i32
    %c0_i32_1 = arith.constant 0 : i32
    return %c0_i32, %c0_i32_0 : i32, i32
  }
  func.func @transform_2(%arg0: i32) -> (i32, i32) {
    %c0_i32 = arith.constant 0 : i32
    %c0_i32_0 = arith.constant 0 : i32
    %c0_i32_1 = arith.constant 0 : i32
    return %c0_i32, %c0_i32_0 : i32, i32
  }
  func.func @transform_3(%arg0: i32) -> (i32, i32) {
    %c0_i32 = arith.constant 0 : i32
    %c0_i32_0 = arith.constant 0 : i32
    %c0_i32_1 = arith.constant 0 : i32
    return %c0_i32, %c0_i32_0 : i32, i32
  }
  func.func @transform_4(%arg0: i32) -> (i32, i32) {
    %c0_i32 = arith.constant 0 : i32
    %c0_i32_0 = arith.constant 0 : i32
    %c0_i32_1 = arith.constant 0 : i32
    return %c0_i32, %c0_i32_0 : i32, i32
  }
  func.func @transform_5(%arg0: i32) -> (i32, i32) {
    %c0_i32 = arith.constant 0 : i32
    %c0_i32_0 = arith.constant 0 : i32
    %c0_i32_1 = arith.constant 0 : i32
    return %c0_i32, %c0_i32_0 : i32, i32
  }
  func.func @transform_6(%arg0: i32) -> (i32, i32) {
    %c0_i32 = arith.constant 0 : i32
    %c0_i32_0 = arith.constant 0 : i32
    %c0_i32_1 = arith.constant 0 : i32
    return %c0_i32, %c0_i32_0 : i32, i32
  }
  func.func @transform_7(%arg0: i32) -> (i32, i32) {
    %c0_i32 = arith.constant 0 : i32
    %c0_i32_0 = arith.constant 0 : i32
    %c0_i32_1 = arith.constant 0 : i32
    return %c0_i32, %c0_i32_0 : i32, i32
  }
  func.func @transform_8(%arg0: i32) -> (i32, i32) {
    %c0_i32 = arith.constant 0 : i32
    %c0_i32_0 = arith.constant 0 : i32
    return %arg0, %c0_i32 : i32, i32
  }
}

</mosaic_0001>

<bundles_post_ra>
// kernel: cnn_forward.1
= control target key start
LH: loop header
LB: loop body
LE: loop exit
PB: predicated region body
PF: predicated region fallthrough
CT: control target
= control target key end

     0   :  { %13 = vsyncpa [#allocation3], 0  ;;  %s2109_s0 = inlined_call_operand.vmem [shape: f32[2,1536], index: 0, kind: input, shape index: {}]   ;;  %s2110_s1 = inlined_call_operand.hbm [shape: bf16[1536,128], index: 1, kind: input, shape index: {}]   ;;  %s2111_s2 = inlined_call_operand.vmem [shape: bf16[64,32], index: 2, kind: input, shape index: {}]   ;;  %s2112_s3 = inlined_call_operand.vmem [shape: f32[8,128], index: 3, kind: input, shape index: {}]   ;;  %s2113_s4 = inlined_call_operand.vmem [shape: bf16[16,4], index: 4, kind: input, shape index: {}]   ;;  %s2114_s5 = inlined_call_operand.vmem [shape: bf16[4,16], index: 5, kind: input, shape index: {}]   ;;  %s2115_s6 = inlined_call_operand.vmem [shape: bf16[16,8], index: 6, kind: input, shape index: {}]   ;;  %s2116_s7 = inlined_call_operand.vmem [shape: bf16[8,2], index: 7, kind: input, shape index: {}]   ;;  %s2117_s8 = inlined_call_operand.hbm [shape: f32[2,2], index: 8, kind: output, shape index: {}]  }
   0x1   :  { %14 = vsyncpa [#allocation4], 0  ;;  %s1944_s27 = smov [#allocation2]   ;;  %s1896_s9 = scalar_lea.hbm %s2110_s1, 12288 }
   0x2   :  { %s22_s28 = sshll.u32 %s1944_s27, 4  ;;  %p1897_p0 = scmp.ne.s32.totalorder %s2110_s1, %s1896_s9  ;;  %s23_s28 = int_to_ptr.vmem [resolvable:$true] %s22_s28 }
   0x3   :  { %p1900_p1 = scmp.lt.u32.totalorder %s1896_s9, %s2110_s1 }
   0x5   :  { %p1902_p2 = pnand %p1900_p1, %p1897_p0 }
   0x7   :  { %1905 = shalt.err (!%p1902_p2)
}
   0x8   :  { %s1906_s14 = scalar_lea.vmem %s23_s28, 12288  ;;  %p1911_p4 = scmp.lt.s32.totalorder %s23_s28, %s23_s28 }
   0x9   :  { %p1907_p3 = scmp.ne.s32.totalorder %s23_s28, %s1906_s14  ;;  %p1912_p5 = scmp.lt.s32.totalorder %s1906_s14, %s1906_s14 }
   0xb   :  { %p1913_p6 = por %p1912_p5, %p1911_p4 }
   0xd   :  { %p1914_p7 = pnand %p1913_p6, %p1907_p3 }
   0xf   :  { %1917 = shalt.err (!%p1914_p7)
}
  0x10   :  { %s1945_s15 = smov 64   ;;  %s1946_s16 = smov 4  }
  0x11   :  { %28 = dma.hbm_to_vmem [thread:$0]  %s2110_s1, 12288, %s23_s28, [#allocation3], %s1945_s15, %s1945_s15, %s1946_s16  }
  0x12   :  { %1940 = dma.done.wait [#allocation3], 12288  }
  0x13   :  { %1941 = vsyncadd [#allocation3], 4294955008  ;;  %v1787_v0 = vld [vmem:[#allocation2 + $0x40] sm:$0xff]   ;;  %v1791_v4 = vld [vmem:[#allocation2 + $0x48] sm:$0xff]   ;;  %v1947_v22 = vmov 1983009808   ;;  %v56_v24 = vlaneseq }
  0x14   :  { %v1788_v1 = vld [vmem:[#allocation2 + $0xc0] sm:$0xff]   ;;  %1598 = vmatprep.subr.bf16.mxu0 %v1787_v0  ;;  %v1792_v5 = vld [vmem:[#allocation2 + $0xc8] sm:$0xff]   ;;  %v1795_v8 = vld [vmem:[#allocation2 + $0x50] sm:$0xff]   ;;  %v54_v23 = vunpack.c.l.s4 %v1947_v22  ;;  %vm1949_vm0 = vmmov 0   ;;  %vm1192_vm1 = vcmask 523264   ;;  %vm1312_vm2 = vcmask 1041408  }
  0x15   :  { %v1789_v2 = vld [vmem:[#allocation2] sm:$0xff]   ;;  %1620 = vmatprep.subr.bf16.mxu1 %v1788_v1  ;;  %v1793_v6 = vld [vmem:[#allocation2 + $0x8] sm:$0xff]   ;;  %v1796_v9 = vld [vmem:[#allocation2 + $0xd0] sm:$0xff]   ;;  %v2011_v30 = vshrl.u32 %v56_v24, 7  ;;  %vm1261_vm3 = vcmask 130048   ;;  %vm1308_vm4 = vcmask 31744  }
  0x16   :  { %v1790_v3 = vld [vmem:[#allocation2 + $0x80] sm:$0xff]   ;;  %1599 = vmatpush3.bf16.msra.mxu0 %v1789_v2  ;;  %v1794_v7 = vld [vmem:[#allocation2 + $0x88] sm:$0xff]   ;;  %v1797_v10 = vld [vmem:[#allocation2 + $0x10] sm:$0xff]   ;;  %v55_v29 = vunpack.c.0.s8 %v54_v23  ;;  %vm1430_vm5 = vcmask 1043456   ;;  %vm1426_vm6 = vcmask 64512   ;;  %vm1474_vm7 = vcmask 9216  }
  0x17   :  { %1621 = vmatpush3.bf16.msra.mxu1 %v1790_v3  ;;  %1600 = vmatprep.subr.bf16.mxu0 %v1791_v4  ;;  %v1798_v11 = vld [vmem:[#allocation2 + $0x90] sm:$0xff]   ;;  %v1799_v12 = vld [vmem:[#allocation2 + $0x58] sm:$0xff]   ;;  %v1803_v16 = vld [vmem:[#allocation2 + $0x60] sm:$0xff]  }
  0x18   :  { %1622 = vmatprep.subr.bf16.mxu1 %v1792_v5  ;;  %v1800_v13 = vld [vmem:[#allocation2 + $0xd8] sm:$0xff]   ;;  %v1804_v17 = vld [vmem:[#allocation2 + $0xe0] sm:$0xff]   ;;  %v1807_v20 = vld [vmem:[#allocation2 + $0x68] sm:$0xff]   ;;  %v2014_v35 = vsub.s32 %v55_v29, %v2011_v30 }
  0x19   :  { %v1801_v14 = vld [vmem:[#allocation2 + $0x18] sm:$0xff]   ;;  %v1805_v18 = vld [vmem:[#allocation2 + $0x20] sm:$0xff]   ;;  %v1808_v21 = vld [vmem:[#allocation2 + $0xe8] sm:$0xff]  }
  0x1a   :  { %1601 = vmatpush3.bf16.msra.mxu0 %v1793_v6  ;;  %v1802_v15 = vld [vmem:[#allocation2 + $0x98] sm:$0xff]   ;;  %v1806_v19 = vld [vmem:[#allocation2 + $0xa0] sm:$0xff]   ;;  %v1809_v25 = vld [vmem:[#allocation2 + $0x28] sm:$0xff]  }
  0x1b   :  { %1623 = vmatpush3.bf16.msra.mxu1 %v1794_v7  ;;  %1602 = vmatprep.subr.bf16.mxu0 %v1795_v8  ;;  %v1810_v26 = vld [vmem:[#allocation2 + $0xa8] sm:$0xff]   ;;  %v1811_v27 = vld [vmem:[#allocation2 + $0x70] sm:$0xff]   ;;  %v1815_v33 = vld [vmem:[#allocation2 + $0x78] sm:$0xff]  }
  0x1c   :  { %1624 = vmatprep.subr.bf16.mxu1 %v1796_v9  ;;  %v1812_v28 = vld [vmem:[#allocation2 + $0xf0] sm:$0xff]   ;;  %v1816_v34 = vld [vmem:[#allocation2 + $0xf8] sm:$0xff]   ;;  %v46_v38 = vld [vmem:[%s2109_s0] sm:$0xff] }
  0x1d   :  { %v1813_v31 = vld [vmem:[#allocation2 + $0x30] sm:$0xff]   ;;  %v1817_v36 = vld [vmem:[#allocation2 + $0x38] sm:$0xff]   ;;  %v59_v39 = vrot.slane %v46_v38, %v2014_v35  ;;  %v52_v40 = vcombine.high %v46_v38, %v46_v38  ;;  %v1820_v41 = vld [vmem:[#allocation2 + $0x140] sm:$0xff]  }
  0x1e   :  { %1603 = vmatpush3.bf16.msra.mxu0 %v1797_v10  ;;  %v1814_v32 = vld [vmem:[#allocation2 + $0xb0] sm:$0xff]   ;;  %v1818_v37 = vld [vmem:[#allocation2 + $0xb8] sm:$0xff]   ;;  %v1821_v42 = vld [vmem:[#allocation2 + $0x1c0] sm:$0xff]  }
  0x1f   :  { %1625 = vmatpush3.bf16.msra.mxu1 %v1798_v11  ;;  %1604 = vmatprep.subr.bf16.mxu0 %v1799_v12  ;;  %v67_v43 = vcombine.high %v59_v39, %v59_v39  ;;  %v66_v44 = vrot.slane %v52_v40, %v2014_v35  ;;  %v115_v45 = vpack.c.bf16 %v59_v39, %v59_v39  ;;  %v1822_v46 = vld [vmem:[#allocation2 + $0x100] sm:$0xff]   ;;  %v1824_v51 = vld [vmem:[#allocation2 + $0x148] sm:$0xff]   ;;  %v1828_v56 = vld [vmem:[#allocation2 + $0x150] sm:$0xff]  }
  0x20   :  { %1626 = vmatprep.subr.bf16.mxu1 %v1800_v13  ;;  %v1823_v49 = vld [vmem:[#allocation2 + $0x180] sm:$0xff]   ;;  %v1825_v53 = vld [vmem:[#allocation2 + $0x1c8] sm:$0xff]   ;;  %v1829_v57 = vld [vmem:[#allocation2 + $0x1d0] sm:$0xff]  }
  0x21   :  { %v116_v47 = vpack.c.bf16 %v67_v43, %v67_v43  ;;  %v68_v48 = vcombine.high %v66_v44, %v66_v44  ;;  %v117_v50 = vpack.c.bf16 %v66_v44, %v66_v44  ;;  %v1826_v54 = vld [vmem:[#allocation2 + $0x108] sm:$0xff]   ;;  %v1830_v58 = vld [vmem:[#allocation2 + $0x110] sm:$0xff]   ;;  %v1832_v60 = vld [vmem:[#allocation2 + $0x158] sm:$0xff]  }
  0x22   :  { %1605 = vmatpush3.bf16.msra.mxu0 %v1801_v14  ;;  %v1827_v55 = vld [vmem:[#allocation2 + $0x188] sm:$0xff]   ;;  %v1831_v59 = vld [vmem:[#allocation2 + $0x190] sm:$0xff]   ;;  %v1833_v61 = vld [vmem:[#allocation2 + $0x1d8] sm:$0xff]  }
  0x23   :  { %1627 = vmatpush3.bf16.msra.mxu1 %v1802_v15  ;;  %1606 = vmatprep.subr.bf16.mxu0 %v1803_v16  ;;  %v118_v52 = vpack.c.bf16 %v68_v48, %v68_v48  ;;  %v1834_v62 = vld [vmem:[#allocation2 + $0x118] sm:$0xff]   ;;  %v1836_v0 = vld [vmem:[#allocation2 + $0x160] sm:$0xff]   ;;  %v1840_v4 = vld [vmem:[#allocation2 + $0x168] sm:$0xff]  }
  0x24   :  { %1628 = vmatprep.subr.bf16.mxu1 %v1804_v17  ;;  %931 = vmatprep.mubr.bf16.mxu0 %v116_v47  ;;  %v1835_v63 = vld [vmem:[#allocation2 + $0x198] sm:$0xff]   ;;  %v1837_v1 = vld [vmem:[#allocation2 + $0x1e0] sm:$0xff]   ;;  %v1841_v5 = vld [vmem:[#allocation2 + $0x1e8] sm:$0xff]  }
  0x25   :  { %971 = vmatprep.mubr.bf16.mxu1 %v118_v52  ;;  %v1838_v2 = vld [vmem:[#allocation2 + $0x120] sm:$0xff]   ;;  %v1842_v6 = vld [vmem:[#allocation2 + $0x128] sm:$0xff]   ;;  %v1844_v8 = vld [vmem:[#allocation2 + $0x170] sm:$0xff]  }
  0x26   :  { %1607 = vmatpush3.bf16.msra.mxu0 %v1805_v18  ;;  %v1839_v3 = vld [vmem:[#allocation2 + $0x1a0] sm:$0xff]   ;;  %v1843_v7 = vld [vmem:[#allocation2 + $0x1a8] sm:$0xff]   ;;  %v1845_v9 = vld [vmem:[#allocation2 + $0x1f0] sm:$0xff]  }
  0x27   :  { %1629 = vmatpush3.bf16.msra.mxu1 %v1806_v19  ;;  %1608 = vmatprep.subr.bf16.mxu0 %v1807_v20  ;;  %v1846_v10 = vld [vmem:[#allocation2 + $0x130] sm:$0xff]   ;;  %v1848_v12 = vld [vmem:[#allocation2 + $0x178] sm:$0xff]   ;;  %v47_v15 = vld [vmem:[%s2109_s0 + $0x8] sm:$0xff] }
  0x28   :  { %1630 = vmatprep.subr.bf16.mxu1 %v1808_v21  ;;  %v1847_v11 = vld [vmem:[#allocation2 + $0x1b0] sm:$0xff]   ;;  %v1849_v13 = vld [vmem:[#allocation2 + $0x1f8] sm:$0xff]   ;;  %v76_v17 = vrot.slane %v47_v15, %v2014_v35  ;;  %v69_v18 = vcombine.high %v47_v15, %v47_v15  ;;  %v1853_v19 = vld [vmem:[#allocation2 + $0x240] sm:$0xff]  }
  0x29   :  { %v1850_v14 = vld [vmem:[#allocation2 + $0x138] sm:$0xff]   ;;  %v1854_v22 = vld [vmem:[#allocation2 + $0x2c0] sm:$0xff]   ;;  %v1857_v29 = vld [vmem:[#allocation2 + $0x248] sm:$0xff]  }
  0x2a   :  { %1609 = vmatpush3.bf16.msra.mxu0 %v1809_v25  ;;  %v1851_v16 = vld [vmem:[#allocation2 + $0x1b8] sm:$0xff]   ;;  %v84_v20 = vcombine.high %v76_v17, %v76_v17  ;;  %v83_v21 = vrot.slane %v69_v18, %v2014_v35  ;;  %v119_v23 = vpack.c.bf16 %v76_v17, %v76_v17  ;;  %v1855_v24 = vld [vmem:[#allocation2 + $0x200] sm:$0xff]   ;;  %v1863_v38 = vld [vmem:[#allocation2 + $0x210] sm:$0xff]  }
  0x2b   :  { %1631 = vmatpush3.bf16.msra.mxu1 %v1810_v26  ;;  %1610 = vmatprep.subr.bf16.mxu0 %v1811_v27  ;;  %v1856_v27 = vld [vmem:[#allocation2 + $0x280] sm:$0xff]   ;;  %v1864_v39 = vld [vmem:[#allocation2 + $0x290] sm:$0xff]   ;;  %v1865_v40 = vld [vmem:[#allocation2 + $0x258] sm:$0xff]  }
  0x2c   :  { %1632 = vmatprep.subr.bf16.mxu1 %v1812_v28  ;;  %v120_v25 = vpack.c.bf16 %v84_v20, %v84_v20  ;;  %v85_v26 = vcombine.high %v83_v21, %v83_v21  ;;  %v121_v28 = vpack.c.bf16 %v83_v21, %v83_v21  ;;  %v1868_v43 = vld [vmem:[#allocation2 + $0x298] sm:$0xff]   ;;  %v1869_v44 = vld [vmem:[#allocation2 + $0x260] sm:$0xff]   ;;  %v1873_v48 = vld [vmem:[#allocation2 + $0x268] sm:$0xff]  }
  0x2d   :  { %v1872_v47 = vld [vmem:[#allocation2 + $0x2a0] sm:$0xff]   ;;  %v1877_v52 = vld [vmem:[#allocation2 + $0x270] sm:$0xff]  }
  0x2e   :  { %1611 = vmatpush3.bf16.msra.mxu0 %v1813_v31  ;;  %v122_v31 = vpack.c.bf16 %v85_v26, %v85_v26 }
  0x2f   :  { %1633 = vmatpush3.bf16.msra.mxu1 %v1814_v32  ;;  %1612 = vmatprep.subr.bf16.mxu0 %v1815_v33  ;;  %v1858_v32 = vld [vmem:[#allocation2 + $0x2c8] sm:$0xff]  }
  0x30   :  { %1634 = vmatprep.subr.bf16.mxu1 %v1816_v34  ;;  %v1859_v33 = vld [vmem:[#allocation2 + $0x208] sm:$0xff]  }
  0x31   :  { %v1860_v34 = vld [vmem:[#allocation2 + $0x288] sm:$0xff]  }
  0x32   :  { %1613 = vmatpush3.bf16.msra.mxu0 %v1817_v36  ;;  %v1861_v36 = vld [vmem:[#allocation2 + $0x250] sm:$0xff]  }
  0x33   :  { %1635 = vmatpush3.bf16.msra.mxu1 %v1818_v37  ;;  %1642 = vmatprep.subr.bf16.mxu0 %v1820_v41  ;;  %v1862_v37 = vld [vmem:[#allocation2 + $0x2d0] sm:$0xff]   ;;  %v1866_v41 = vld [vmem:[#allocation2 + $0x2d8] sm:$0xff]  }
  0x34   :  { %1664 = vmatprep.subr.bf16.mxu1 %v1821_v42  ;;  %v1867_v42 = vld [vmem:[#allocation2 + $0x218] sm:$0xff]  }
  0x35   :  { %932 = vmatmul.mubr.bf16.vlgmr.msra.gmra.mrb[0].mxu0 %v115_v45  ;;  %v1870_v45 = vld [vmem:[#allocation2 + $0x2e0] sm:$0xff]  }
  0x36   :  { %1643 = vmatpush3.bf16.msra.mxu0 %v1822_v46  ;;  %972 = vmatmul.mubr.bf16.vlgmr.msra.gmra.mrb[0].mxu1 %v117_v50  ;;  %v1871_v46 = vld [vmem:[#allocation2 + $0x220] sm:$0xff]   ;;  %v1875_v50 = vld [vmem:[#allocation2 + $0x228] sm:$0xff]  }
  0x37   :  { %1644 = vmatprep.subr.bf16.mxu0 %v1824_v51  ;;  %1665 = vmatpush3.bf16.msra.mxu1 %v1823_v49  ;;  %v1874_v49 = vld [vmem:[#allocation2 + $0x2e8] sm:$0xff]  }
  0x38   :  { %1666 = vmatprep.subr.bf16.mxu1 %v1825_v53  ;;  %1011 = vmatprep.mubr.bf16.mxu0 %v120_v25  ;;  %v1876_v51 = vld [vmem:[#allocation2 + $0x2a8] sm:$0xff]   ;;  %v1878_v53 = vld [vmem:[#allocation2 + $0x2f0] sm:$0xff]  }
  0x39   :  { %1051 = vmatprep.mubr.bf16.mxu1 %v122_v31 }
  0x3a   :  { %1645 = vmatpush3.bf16.msra.mxu0 %v1826_v54  ;;  %v1879_v54 = vld [vmem:[#allocation2 + $0x230] sm:$0xff]  }
  0x3b   :  { %1646 = vmatprep.subr.bf16.mxu0 %v1828_v56  ;;  %1667 = vmatpush3.bf16.msra.mxu1 %v1827_v55  ;;  %v1880_v55 = vld [vmem:[#allocation2 + $0x2b0] sm:$0xff]   ;;  %v1881_v56 = vld [vmem:[#allocation2 + $0x278] sm:$0xff]  }
  0x3c   :  { %1668 = vmatprep.subr.bf16.mxu1 %v1829_v57  ;;  %v1882_v57 = vld [vmem:[#allocation2 + $0x2f8] sm:$0xff]  }
  0x3e   :  { %1647 = vmatpush3.bf16.msra.mxu0 %v1830_v58  ;;  %v1883_v58 = vld [vmem:[#allocation2 + $0x238] sm:$0xff]  }
  0x3f   :  { %1648 = vmatprep.subr.bf16.mxu0 %v1832_v60  ;;  %1669 = vmatpush3.bf16.msra.mxu1 %v1831_v59  ;;  %v48_v59 = vld [vmem:[%s2109_s0 + $0x10] sm:$0xff]  ;;  %v1884_v60 = vld [vmem:[#allocation2 + $0x2b8] sm:$0xff]  }
  0x40   :  { %1670 = vmatprep.subr.bf16.mxu1 %v1833_v61  ;;  %v93_v61 = vrot.slane %v48_v59, %v2014_v35 }
  0x42   :  { %1649 = vmatpush3.bf16.msra.mxu0 %v1834_v62  ;;  %v86_v62 = vcombine.high %v48_v59, %v48_v59 }
  0x43   :  { %1650 = vmatprep.subr.bf16.mxu0 %v1836_v0  ;;  %1671 = vmatpush3.bf16.msra.mxu1 %v1835_v63  ;;  %v101_v63 = vcombine.high %v93_v61, %v93_v61 }
  0x44   :  { %1672 = vmatprep.subr.bf16.mxu1 %v1837_v1  ;;  %v100_v0 = vrot.slane %v86_v62, %v2014_v35  ;;  %v123_v1 = vpack.c.bf16 %v93_v61, %v93_v61  ;;  %v1887_v35 = vld [vmem:[%s2111_s2 + $0x8] sm:$0xff]   ;;  %v1890_v61 = vld [vmem:[%s2113_s4] sm:$0xff]   ;;  %v1166_v62 = vsub.s32 3, %v2011_v30  ;;  %s1950_s4 = smov 112  }
  0x46   :  { %1651 = vmatpush3.bf16.msra.mxu0 %v1838_v2  ;;  %v124_v2 = vpack.c.bf16 %v101_v63, %v101_v63 }
  0x47   :  { %1652 = vmatprep.subr.bf16.mxu0 %v1840_v4  ;;  %1673 = vmatpush3.bf16.msra.mxu1 %v1839_v3  ;;  %v102_v3 = vcombine.high %v100_v0, %v100_v0  ;;  %v125_v4 = vpack.c.bf16 %v100_v0, %v100_v0  ;;  %v1239_v0 = vsub.s32 4, %v2011_v30 }
  0x48   :  { %1674 = vmatprep.subr.bf16.mxu1 %v1841_v5 }
  0x49   :  { %v126_v5 = vpack.c.bf16 %v102_v3, %v102_v3 }
  0x4a   :  { %1653 = vmatpush3.bf16.msra.mxu0 %v1842_v6  ;;  %v1886_v6 = vld [vmem:[%s2111_s2] sm:$0xff]  }
  0x4b   :  { %1654 = vmatprep.subr.bf16.mxu0 %v1844_v8  ;;  %1675 = vmatpush3.bf16.msra.mxu1 %v1843_v7  ;;  %v1948_v7 = vmov 0.0   ;;  %v1888_v8 = vld [vmem:[%s2111_s2 + $0x10] sm:$0xff]  }
  0x4c   :  { %1676 = vmatprep.subr.bf16.mxu1 %v1845_v9  ;;  %v321_v9 = vsub.s32 0, %v2011_v30 }
  0x4e   :  { %1655 = vmatpush3.bf16.msra.mxu0 %v1846_v10  ;;  %v2049_v10 = vld [vmem:[%s2112_s3] sm:$0xff] }
  0x4f   :  { %1656 = vmatprep.subr.bf16.mxu0 %v1848_v12  ;;  %1677 = vmatpush3.bf16.msra.mxu1 %v1847_v11  ;;  %v322_v12 = vrot.slane %v2049_v10, %v321_v9  ;;  %v1167_v63 = vrot.slane %v2049_v10, %v1166_v62 }
  0x50   :  { %1678 = vmatprep.subr.bf16.mxu1 %v1849_v13 }
  0x52   :  { %1657 = vmatpush3.bf16.msra.mxu0 %v1850_v14 }
  0x53   :  { %1686 = vmatprep.subr.bf16.mxu0 %v1853_v19  ;;  %1679 = vmatpush3.bf16.msra.mxu1 %v1851_v16 }
  0x54   :  { %1708 = vmatprep.subr.bf16.mxu1 %v1854_v22 }
  0x55   :  { %1012 = vmatmul.mubr.bf16.vlgmr.msra.gmra.mrb[4].mxu0 %v119_v23 }
  0x56   :  { %1687 = vmatpush3.bf16.msra.mxu0 %v1855_v24  ;;  %1052 = vmatmul.mubr.bf16.vlgmr.msra.gmra.mrb[4].mxu1 %v121_v28 }
  0x57   :  { %1688 = vmatprep.subr.bf16.mxu0 %v1857_v29  ;;  %1709 = vmatpush3.bf16.msra.mxu1 %v1856_v27 }
  0x58   :  { %1710 = vmatprep.subr.bf16.mxu1 %v1858_v32  ;;  %1091 = vmatprep.mubr.bf16.mxu0 %v124_v2 }
  0x59   :  { %1131 = vmatprep.mubr.bf16.mxu1 %v126_v5 }
  0x5a   :  { %1689 = vmatpush3.bf16.msra.mxu0 %v1859_v33 }
  0x5b   :  { %1690 = vmatprep.subr.bf16.mxu0 %v1861_v36  ;;  %1711 = vmatpush3.bf16.msra.mxu1 %v1860_v34 }
  0x5c   :  { %1712 = vmatprep.subr.bf16.mxu1 %v1862_v37 }
  0x5e   :  { %1691 = vmatpush3.bf16.msra.mxu0 %v1863_v38 }
  0x5f   :  { %1692 = vmatprep.subr.bf16.mxu0 %v1865_v40  ;;  %1713 = vmatpush3.bf16.msra.mxu1 %v1864_v39 }
  0x60   :  { %1714 = vmatprep.subr.bf16.mxu1 %v1866_v41 }
  0x62   :  { %1693 = vmatpush3.bf16.msra.mxu0 %v1867_v42 }
  0x63   :  { %1694 = vmatprep.subr.bf16.mxu0 %v1869_v44  ;;  %1715 = vmatpush3.bf16.msra.mxu1 %v1868_v43  ;;  %v1142_v43 = vsub.s32 1, %v2011_v30  ;;  %v1889_v44 = vld [vmem:[%s2111_s2 + $0x18] sm:$0xff]  }
  0x64   :  { %1716 = vmatprep.subr.bf16.mxu1 %v1870_v45 }
  0x66   :  { %1695 = vmatpush3.bf16.msra.mxu0 %v1871_v46 }
  0x67   :  { %1696 = vmatprep.subr.bf16.mxu0 %v1873_v48  ;;  %1717 = vmatpush3.bf16.msra.mxu1 %v1872_v47 }
  0x68   :  { %1718 = vmatprep.subr.bf16.mxu1 %v1874_v49 }
  0x6a   :  { %1697 = vmatpush3.bf16.msra.mxu0 %v1875_v50  ;;  %v1147_v50 = vsub.s32 2, %v2011_v30 }
  0x6b   :  { %1698 = vmatprep.subr.bf16.mxu0 %v1877_v52  ;;  %1719 = vmatpush3.bf16.msra.mxu1 %v1876_v51 }
  0x6c   :  { %1720 = vmatprep.subr.bf16.mxu1 %v1878_v53  ;;  %v1143_v53 = vrot.slane %v2049_v10, %v1142_v43 }
  0x6e   :  { %1699 = vmatpush3.bf16.msra.mxu0 %v1879_v54 }
  0x6f   :  { %1700 = vmatprep.subr.bf16.mxu0 %v1881_v56  ;;  %1721 = vmatpush3.bf16.msra.mxu1 %v1880_v55  ;;  %v1148_v55 = vrot.slane %v2049_v10, %v1147_v50 }
  0x70   :  { %1722 = vmatprep.subr.bf16.mxu1 %v1882_v57 }
  0x72   :  { %1701 = vmatpush3.bf16.msra.mxu0 %v1883_v58 }
  0x73   :  { %1723 = vmatpush3.bf16.msra.mxu1 %v1884_v60  ;;  %1743 = vmatprep.subr.bf16.mxu0 %v1948_v7 }
  0x74   :  { %1755 = vmatprep.subr.bf16.mxu1 %v1948_v7 }
  0x75   :  { %1092 = vmatmul.mubr.bf16.vlgmr.msra.gmra.mrb[8].mxu0 %v123_v1  ;;  %v1244_v1 = vsub.s32 5, %v2011_v30 }
  0x76   :  { %1132 = vmatmul.mubr.bf16.vlgmr.msra.gmra.mrb[8].mxu1 %v125_v4  ;;  %1744 = vmatpush3.bf16.msra.mxu0 %v1886_v6  ;;  %v1240_v4 = vrot.slane %v2049_v10, %v1239_v0 }
  0x77   :  { %1745 = vmatprep.subr.bf16.mxu0 %v1948_v7  ;;  %1751 = vmatprep.mubr.msk.bf16.mxu0 %vm1949_vm0, %v1948_v7  ;;  %v1245_v9 = vrot.slane %v2049_v10, %v1244_v1 }
  0x78   :  { %1757 = vmatprep.mubr.msk.bf16.mxu1 %vm1949_vm0, %v1948_v7  ;;  %1756 = vmatpush3.bf16.msra.mxu1 %v1890_v61 }
  0x79   :  { %1761 = vmatprep.subr.bf16.mxu1 %v1948_v7 }
  0x7a   :  { %1746 = vmatpush3.bf16.msra.mxu0 %v1887_v35 }
  0x7b   :  { %1747 = vmatprep.subr.bf16.mxu0 %v1948_v7 }
  0x7e   :  { %1748 = vmatpush3.bf16.msra.mxu0 %v1888_v8 }
  0x7f   :  { %1749 = vmatprep.subr.bf16.mxu0 %v1948_v7 }
  0x82   :  { %1750 = vmatpush3.bf16.msra.mxu0 %v1889_v44 }
  0x83   :  { %1767 = vmatprep.subr.bf16.mxu0 %v1948_v7 }
 0x108   :  { %v1614_v11 = vpop.f32.mrb[0].mxu0 }
 0x109   :  { %v1615_v13 = vpop.f32.mrb[1].mxu0  ;;  %v1636_v14 = vpop.f32.mrb[0].mxu1 }
 0x10a   :  { %v1616_v15 = vadd.f32 %v1615_v13, %v1614_v11  ;;  %v1617_v16 = vpop.f32.mrb[2].mxu0  ;;  %v1637_v17 = vpop.f32.mrb[1].mxu1 }
 0x10b   :  { %v1618_v18 = vpop.f32.mrb[3].mxu0  ;;  %v1638_v20 = vadd.f32 %v1637_v17, %v1636_v14  ;;  %v1639_v21 = vpop.f32.mrb[2].mxu1  ;;  %v1307_v14 = vld [vmem:[%s2114_s5] sm:$0x3] }
 0x10c   :  { %v934_v19 = vadd.f32 %v1616_v15, %v322_v12  ;;  %v1640_v22 = vpop.f32.mrb[3].mxu1  ;;  %v1314_v17 = vsel %vm1312_vm2, %v1307_v14, 0 }
 0x10e   :  { %v974_v23 = vadd.f32 %v1638_v20, %v934_v19 }
 0x128   :  { %v1658_v24 = vpop.f32.mrb[4].mxu0 }
 0x129   :  { %v1659_v25 = vpop.f32.mrb[5].mxu0  ;;  %v1680_v26 = vpop.f32.mrb[4].mxu1 }
 0x12a   :  { %v1660_v27 = vadd.f32 %v1659_v25, %v1658_v24  ;;  %v1661_v28 = vpop.f32.mrb[6].mxu0  ;;  %v1681_v29 = vpop.f32.mrb[5].mxu1  ;;  %v1891_v24 = vld [vmem:[%s2115_s6] sm:$0xff]   ;;  %s1951_s6 = smov [#allocation5]  }
 0x12b   :  { %v1662_v31 = vpop.f32.mrb[7].mxu0  ;;  %v1682_v33 = vadd.f32 %v1681_v29, %v1680_v26  ;;  %v1683_v34 = vpop.f32.mrb[6].mxu1  ;;  %v1421_v25 = vld [vmem:[%s2116_s7] sm:$0xf]  ;;  %s1482_s7 = sshll.u32 %s1951_s6, 4  ;;  %s1483_s7 = int_to_ptr.vmem [resolvable:$true] %s1482_s7 }
 0x12c   :  { %v1014_v32 = vadd.f32 %v1660_v27, %v974_v23  ;;  %v1684_v36 = vpop.f32.mrb[7].mxu1  ;;  %v1432_v26 = vsel %vm1430_vm5, %v1421_v25, 0  ;;  %s1918_s16 = scalar_lea.vmem %s1483_s7, 32  ;;  %p1923_p9 = scmp.lt.s32.totalorder %s1483_s7, %s1483_s7 }
 0x12d   :  { %p1919_p8 = scmp.ne.s32.totalorder %s1483_s7, %s1918_s16  ;;  %p1924_p10 = scmp.lt.s32.totalorder %s1918_s16, %s1918_s16 }
 0x12e   :  { %v1054_v37 = vadd.f32 %v1682_v33, %v1014_v32 }
 0x12f   :  { %p1925_p11 = por %p1924_p10, %p1923_p9 }
 0x131   :  { %p1926_p12 = pnand %p1925_p11, %p1919_p8 }
 0x148   :  { %v1702_v38 = vpop.f32.mrb[8].mxu0 }
 0x149   :  { %v1703_v39 = vpop.f32.mrb[9].mxu0  ;;  %v1724_v40 = vpop.f32.mrb[8].mxu1 }
 0x14a   :  { %v1704_v41 = vadd.f32 %v1703_v39, %v1702_v38  ;;  %v1705_v42 = vpop.f32.mrb[10].mxu0  ;;  %v1725_v45 = vpop.f32.mrb[9].mxu1  ;;  %v1368_v39 = vsub.s32 6, %v2011_v30 }
 0x14b   :  { %v1706_v46 = vpop.f32.mrb[11].mxu0  ;;  %v1726_v48 = vadd.f32 %v1725_v45, %v1724_v40  ;;  %v1727_v49 = vpop.f32.mrb[10].mxu1 }
 0x14c   :  { %v1094_v47 = vadd.f32 %v1704_v41, %v1054_v37  ;;  %v1728_v51 = vpop.f32.mrb[11].mxu1  ;;  %v1369_v40 = vrot.slane %v2049_v10, %v1368_v39 }
 0x14e   :  { %v1134_v52 = vadd.f32 %v1726_v48, %v1094_v47  ;;  %v1424_v48 = vsub.s32 7, %v2011_v30 }
 0x150   :  { %v1139_v54 = vmax.f32 %v1134_v52, 0.0  ;;  %v1425_v49 = vrot.slane %v2049_v10, %v1424_v48 }
 0x152   :  { %v1144_v56 = vmul.f32 %v1143_v53, %v1139_v54 }
 0x154   :  { %v1149_v57 = vadd.f32 %v1148_v55, %v1144_v56 }
 0x156   :  { %1151 = vrot.lane.b32.xlu0 %v1149_v57, %s1945_s15 }
 0x1c8   :  { %v1152_v58 = vpop.permute.xlu0 %1151 }
 0x1c9   :  { %v1154_v59 = vmax.f32 %v1149_v57, %v1152_v58 }
 0x1cb   :  { %v1155_v60 = vpack.c.bf16 %v1154_v59, %v1154_v59 }
 0x1cd   :  { %1752 = vmatmul.mubr.msk.bf16.vlgmr.msra.gmra.mrb[12].mxu0 %vm1192_vm1, %v1155_v60 }
 0x1ce   :  { %1769 = vmatprep.mubr.msk.bf16.mxu0 %vm1949_vm0, %v1948_v7  ;;  %1768 = vmatpush3.bf16.msra.mxu0 %v1891_v24 }
 0x2a0   :  { %v1230_v2 = vpop.f32.mrb[12].mxu0 }
 0x2a1   :  { %v1231_v3 = vadd.f32 %v1230_v2, %v1167_v63  ;;  %v1753_v5 = vpop.f32.mrb[13].mxu0 }
 0x2a2   :  { %v1233_v6 = vpop.f32.mrb[14].mxu0 }
 0x2a3   :  { %v1236_v35 = vmax.f32 %v1231_v3, 0.0  ;;  %v1754_v8 = vpop.f32.mrb[15].mxu0 }
 0x2a5   :  { %v1241_v11 = vmul.f32 %v1240_v4, %v1236_v35 }
 0x2a7   :  { %v1246_v12 = vadd.f32 %v1245_v9, %v1241_v11 }
 0x2a9   :  { %1248 = vrot.lane.b32.xlu0 %v1246_v12, %s1950_s4 }
 0x31b   :  { %v1249_v13 = vpop.permute.xlu0 %1248 }
 0x31c   :  { %v1251_v15 = vmax.f32 %v1246_v12, %v1249_v13 }
 0x31e   :  { %v1252_v16 = vpack.c.bf16 %v1251_v15, %v1251_v15 }
 0x320   :  { %1758 = vmatmul.mubr.msk.bf16.vlgmr.msra.gmra.mrb[12].mxu1 %vm1261_vm3, %v1252_v16 }
 0x321   :  { %1762 = vmatpush3.bf16.msra.mxu1 %v1314_v17  ;;  %1763 = vmatprep.mubr.msk.bf16.mxu1 %vm1949_vm0, %v1948_v7 }
 0x322   :  { %1773 = vmatprep.subr.bf16.mxu1 %v1948_v7 }
 0x3f3   :  { %v1299_v18 = vpop.f32.mrb[12].mxu1 }
 0x3f4   :  { %v1305_v19 = vmax.f32 %v1299_v18, 0.0  ;;  %v1759_v20 = vpop.f32.mrb[13].mxu1 }
 0x3f5   :  { %v1302_v21 = vpop.f32.mrb[14].mxu1 }
 0x3f6   :  { %v1306_v22 = vpack.c.bf16 %v1305_v19, %v1305_v19  ;;  %v1760_v23 = vpop.f32.mrb[15].mxu1 }
 0x3f8   :  { %1764 = vmatmul.mubr.msk.bf16.vlgmr.msra.gmra.mrb[16].mxu1 %vm1308_vm4, %v1306_v22 }
 0x3f9   :  { %1775 = vmatprep.mubr.msk.bf16.mxu1 %vm1949_vm0, %v1948_v7  ;;  %1774 = vmatpush3.bf16.msra.mxu1 %v1432_v26 }
 0x4cb   :  { %v1350_v27 = vpop.f32.mrb[16].mxu1 }
 0x4cc   :  { %v1356_v28 = vsub.f32 0.0, %v1350_v27  ;;  %v1765_v29 = vpop.f32.mrb[17].mxu1 }
 0x4cd   :  { %v1353_v31 = vpop.f32.mrb[18].mxu1 }
 0x4ce   :  { %v1357_v32 = vmul.f32 1.442695, %v1356_v28  ;;  %v1766_v33 = vpop.f32.mrb[19].mxu1 }
 0x4d0   :  { %1892 = vpow2.f32 %v1357_v32 }
 0x4da   :  { %v1893_v7 = vpop.eup %1892 }
 0x4db   :  { %v1359_v34 = vadd.f32 1.0, %v1893_v7 }
 0x4dd   :  { %1894 = vrcp.f32 %v1359_v34 }
 0x4e7   :  { %v1895_v36 = vpop.eup %1894 }
 0x4e8   :  { %v1362_v37 = vmul.f32 %v1895_v36, %v1251_v15 }
 0x4ea   :  { %v1363_v38 = vpack.c.bf16 %v1362_v37, %v1362_v37 }
 0x4ec   :  { %1770 = vmatmul.mubr.msk.bf16.vlgmr.msra.gmra.mrb[16].mxu0 %vm1261_vm3, %v1363_v38 }
 0x5bf   :  { %v1413_v41 = vpop.f32.mrb[16].mxu0 }
 0x5c0   :  { %v1414_v42 = vadd.f32 %v1413_v41, %v1369_v40  ;;  %v1771_v43 = vpop.f32.mrb[17].mxu0 }
 0x5c1   :  { %v1416_v44 = vpop.f32.mrb[18].mxu0 }
 0x5c2   :  { %v1419_v45 = vmax.f32 %v1414_v42, 0.0  ;;  %v1772_v46 = vpop.f32.mrb[19].mxu0 }
 0x5c4   :  { %v1420_v47 = vpack.c.bf16 %v1419_v45, %v1419_v45 }
 0x5c6   :  { %1776 = vmatmul.mubr.msk.bf16.vlgmr.msra.gmra.mrb[20].mxu1 %vm1426_vm6, %v1420_v47 }
 0x699   :  { %v1468_v50 = vpop.f32.mrb[20].mxu1 }
 0x69a   :  { %v1469_v51 = vadd.f32 %v1468_v50, %v1425_v49  ;;  %v1777_v52 = vpop.f32.mrb[21].mxu1 }
 0x69b   :  { %v1471_v53 = vpop.f32.mrb[22].mxu1 }
 0x69c   :  { %v1778_v54 = vpop.f32.mrb[23].mxu1  ;;  %1475 = vst.msk [vmem:[#allocation5] sm:$0x3] %vm1474_vm7, %v1469_v51 }
 0x69d   :  { %1929 = shalt.err (!%p1926_p12)
}
 0x69e   :  { %s1930_s1 = scalar_lea.hbm %s2117_s8, 32 }
 0x69f   :  { %p1931_p13 = scmp.ne.s32.totalorder %s2117_s8, %s1930_s1  ;;  %p1934_p0 = scmp.lt.u32.totalorder %s1930_s1, %s2117_s8 }
 0x6a1   :  { %p1936_p1 = pnand %p1934_p0, %p1931_p13 }
 0x6a3   :  { %1939 = shalt.err (!%p1936_p1)
}
 0x6a4   :  { %1485 = dma.vmem_to_hbm [thread:$0]  %s1483_s7, 32, %s2117_s8, [#allocation4]  }
 0x6a5   :  { %1942 = dma.done.wait [#allocation4], 32  }
 0x6a6   :  { %1943 = vsyncadd [#allocation4], 4294967264 }
 0x6a7   :  { %1489 = vsyncpa [#allocation3], 1 }
 0x6a8   :  { %1490 = vsyncpa [#allocation4], 1 }

</bundles_post_ra>
